<compile_context>
chip_gen: v6e
topology: v6e:2x2x1
jax: 0.10.0
libtpu: 0.0.40
codegen_flags: <defaults>
</compile_context>

<pallas_src>
import jax
import jax.numpy as jnp
from jax.experimental import pallas as pl
from jax.experimental.pallas import tpu as pltpu


def _ppsa_kernel(x_ref, q_ref, wq_ref, bq_ref, wv_ref, bv_ref, wz_ref, bz_ref,
                 gamma_ref, beta_ref, out_ref, m_ref, l_ref, acc_ref):
    hw_i = pl.program_id(1)

    @pl.when(hw_i == 0)
    def _init():
        m_ref[...] = jnp.full_like(m_ref, -jnp.inf)
        l_ref[...] = jnp.zeros_like(l_ref)
        acc_ref[...] = jnp.zeros_like(acc_ref)

    # (C, THW) tiles; cast so bf16-streamed activations still do f32 math.
    x = x_ref[0].astype(jnp.float32)
    q = q_ref[0].astype(jnp.float32)

    # Lane-dense query logits: (1, C) @ (C, THW) -> (1, THW).
    logits = jnp.dot(wq_ref[...], q, preferred_element_type=jnp.float32) + bq_ref[...]

    # Online softmax over the HW axis (flash-style running max / denom / acc).
    m_prev = m_ref[...]                                                  # (1, 1)
    m_new = jnp.maximum(m_prev, jnp.max(logits, axis=-1, keepdims=True))  # (1, 1)
    alpha = jnp.exp(m_prev - m_new)                                       # (1, 1)
    e = jnp.exp(logits - m_new)                                           # (1, THW)
    l_ref[...] = alpha * l_ref[...] + jnp.sum(e, axis=-1, keepdims=True)
    # Weighted channel sum:  acc[c] += sum_hw e[hw] * x[c, hw]   (VPU mul + lane reduce)
    acc_ref[...] = alpha * acc_ref[...] + jnp.sum(x * e, axis=-1, keepdims=True)
    m_ref[...] = m_new

    @pl.when(hw_i == pl.num_programs(1) - 1)
    def _finalize():
        # Softmax normalization folded into one (1,1) divide per batch element.
        s = jnp.transpose(acc_ref[...]) / l_ref[...]                      # (1, C)
        # z = s @ Wv + bv  — exact reorder of attn^T @ (x @ Wv + bv) since sum(attn)=1.
        z = jnp.dot(s, wv_ref[...], preferred_element_type=jnp.float32) + bv_ref[...]  # (1, C/2)
        y = jnp.dot(z, wz_ref[...], preferred_element_type=jnp.float32) + bz_ref[...]  # (1, C)
        # LayerNorm over C (biased variance, eps=1e-5 — PyTorch semantics) + sigmoid.
        mu = jnp.mean(y, axis=-1, keepdims=True)
        var = jnp.mean((y - mu) ** 2, axis=-1, keepdims=True)
        yn = (y - mu) * jax.lax.rsqrt(var + 1e-5)
        yn = yn * gamma_ref[...] + beta_ref[...]
        out_ref[0] = jax.nn.sigmoid(yn)                                   # (1, C), lane-dense


def _pick_hw_tile(hw, max_tile):
    """Largest multiple of 128 that divides hw and is <= max_tile (else hw itself)."""
    if hw <= max_tile:
        return hw
    t = (max_tile // 128) * 128
    while t >= 128:
        if hw % t == 0:
            return t
        t -= 128
    return hw


def ppsa_channel_weight(x_nchw, q_nchw, params, *, hw_tile=1024):
    """x_nchw, q_nchw: (B, C, H, W). Returns (B, C, 1, 1) channel weight."""
    b, c, h, w = x_nchw.shape
    hw = h * w
    # NCHW -> (B, C, HW): a pure reshape — no transpose, no extra HBM traffic.
    xf = x_nchw.reshape(b, c, hw)
    qf = q_nchw.reshape(b, c, hw)

    thw = _pick_hw_tile(hw, hw_tile)
    nhw = hw // thw

    const = lambda arr: pl.BlockSpec(arr.shape, lambda i, j: (0,) * arr.ndim)

    out = pl.pallas_call(
        _ppsa_kernel,
        out_shape=jax.ShapeDtypeStruct((b, 1, c), jnp.float32),
        grid=(b, nhw),
        in_specs=[
            pl.BlockSpec((1, c, thw), lambda i, j: (i, 0, j)),   # x  (B, C, HW)
            pl.BlockSpec((1, c, thw), lambda i, j: (i, 0, j)),   # q  (B, C, HW)
            const(params["wq"]),      # (1, C)
            const(params["bq"]),      # (1, 1)
            const(params["wv"]),      # (C, C/2)
            const(params["bv"]),      # (1, C/2)
            const(params["wz"]),      # (C/2, C)
            const(params["bz"]),      # (1, C)
            const(params["gamma"]),   # (1, C)
            const(params["beta"]),    # (1, C)
        ],
        out_specs=pl.BlockSpec((1, 1, c), lambda i, j: (i, 0, 0)),
        scratch_shapes=[
            pltpu.VMEM((1, 1), jnp.float32),   # running max  m
            pltpu.VMEM((1, 1), jnp.float32),   # running denom l
            pltpu.VMEM((c, 1), jnp.float32),   # running weighted channel sum
        ],
        compiler_params=pltpu.CompilerParams(
            dimension_semantics=("parallel", "arbitrary"),
            vmem_limit_bytes=64 * 1024 * 1024,
        ),
    )(xf, qf, params["wq"], params["bq"], params["wv"], params["bv"],
      params["wz"], params["bz"], params["gamma"], params["beta"])

    # (B, 1, C) -> (B, C, 1, 1): same memory order, pure reshape.
    return out.reshape(b, c, 1, 1)


def ref_forward(x_nchw, q_nchw, p):
    """Pure-JAX reference mirroring the PyTorch forward."""
    b, c, h, w = x_nchw.shape
    hw = h * w
    xf = x_nchw.reshape(b, c, hw).astype(jnp.float32)
    qf = q_nchw.reshape(b, c, hw).astype(jnp.float32)
    v = jnp.einsum("ci,bch->bih", p["wv"], xf) + p["bv"][0][None, :, None]   # (B, C/2, HW)
    logits = jnp.einsum("oc,bch->boh", p["wq"], qf) + p["bq"][0, 0]          # (B, 1, HW)
    attn = jax.nn.softmax(logits, axis=-1)                                    # Softmax over HW
    z = jnp.sum(v * attn, axis=-1)                                            # (B, C/2)
    y = z @ p["wz"] + p["bz"][0]                                              # (B, C)
    mu = jnp.mean(y, axis=-1, keepdims=True)
    var = jnp.mean((y - mu) ** 2, axis=-1, keepdims=True)
    yn = (y - mu) / jnp.sqrt(var + 1e-5) * p["gamma"][0] + p["beta"][0]
    return jax.nn.sigmoid(yn).reshape(b, c, 1, 1)


def make_params(key, c):
    # Weights stored in the kernel's (C_in, C_out) orientation; converting real
    # PyTorch (C_out, C_in, 1, 1) conv weights is a one-time transpose outside.
    ks = jax.random.split(key, 8)
    c2 = c // 2
    s = 0.1
    return {
        "wq": s * jax.random.normal(ks[0], (1, c), jnp.float32),
        "bq": s * jax.random.normal(ks[1], (1, 1), jnp.float32),
        "wv": s * jax.random.normal(ks[2], (c, c2), jnp.float32),
        "bv": s * jax.random.normal(ks[3], (1, c2), jnp.float32),
        "wz": s * jax.random.normal(ks[4], (c2, c), jnp.float32),
        "bz": s * jax.random.normal(ks[5], (1, c), jnp.float32),
        "gamma": 1.0 + s * jax.random.normal(ks[6], (1, c), jnp.float32),
        "beta": s * jax.random.normal(ks[7], (1, c), jnp.float32),
    }
    # NOTE: sp_wv / sp_wq / agp exist in __init__ but are unused by forward -> omitted.


if __name__ == "__main__":
    key = jax.random.PRNGKey(0)
    kx, kq, kp = jax.random.split(key, 3)

    B, C, H, W = 2, 8, 16, 16
    x = jax.random.normal(kx, (B, C, H, W), jnp.float32)
    q = jax.random.normal(kq, (B, C, H, W), jnp.float32)
    params = make_params(kp, C)

    ref = jax.block_until_ready(ref_forward(x, q, params))

    # Single-HW-tile path (HW=256 fits one block).
    out = jax.block_until_ready(ppsa_channel_weight(x, q, params))
    assert out.shape == (B, C, 1, 1), out.shape
    assert jnp.allclose(out, ref, rtol=1e-4, atol=1e-4), float(jnp.max(jnp.abs(out - ref)))

    # Tiled path: force 2 HW tiles of 128 to exercise the online-softmax accumulation.
    out_tiled = jax.block_until_ready(ppsa_channel_weight(x, q, params, hw_tile=128))
    assert jnp.allclose(out_tiled, ref, rtol=1e-4, atol=1e-4), \
        float(jnp.max(jnp.abs(out_tiled - ref)))

    print("KERNEL_OK")
</pallas_src>

<mosaic_0001>
module attributes {stable_mosaic.version = 11 : i64} {
  func.func @_ppsa_kernel(%arg0: i32, %arg1: i32, %arg2: memref<1x8x256xf32, #tpu.memory_space<vmem>>, %arg3: memref<1x8x256xf32, #tpu.memory_space<vmem>>, %arg4: memref<1x8xf32, #tpu.memory_space<vmem>>, %arg5: memref<1x1xf32, #tpu.memory_space<vmem>>, %arg6: memref<8x4xf32, #tpu.memory_space<vmem>>, %arg7: memref<1x4xf32, #tpu.memory_space<vmem>>, %arg8: memref<4x8xf32, #tpu.memory_space<vmem>>, %arg9: memref<1x8xf32, #tpu.memory_space<vmem>>, %arg10: memref<1x8xf32, #tpu.memory_space<vmem>>, %arg11: memref<1x8xf32, #tpu.memory_space<vmem>>, %arg12: memref<1x1x8xf32, #tpu.memory_space<vmem>>, %arg13: memref<1x1xf32, #tpu.memory_space<vmem>>, %arg14: memref<1x1xf32, #tpu.memory_space<vmem>>, %arg15: memref<8x1xf32, #tpu.memory_space<vmem>>) attributes {dimension_semantics = [#tpu.dimension_semantics<parallel>, #tpu.dimension_semantics<arbitrary>], iteration_bounds = array<i64: 2, 1>, scalar_prefetch = 0 : i64, scratch_operands = 3 : i64, tpu.core_type = #tpu.core_type<tc>, window_params = [{transform_indices = @transform_0, window_bounds = array<i64: 1, 8, 256>}, {transform_indices = @transform_1, window_bounds = array<i64: 1, 8, 256>}, {pipeline_mode = #tpu.pipeline_mode<synchronous>, transform_indices = @transform_2, window_bounds = array<i64: 1, 8>}, {pipeline_mode = #tpu.pipeline_mode<synchronous>, transform_indices = @transform_3, window_bounds = array<i64: 1, 1>}, {pipeline_mode = #tpu.pipeline_mode<synchronous>, transform_indices = @transform_4, window_bounds = array<i64: 8, 4>}, {pipeline_mode = #tpu.pipeline_mode<synchronous>, transform_indices = @transform_5, window_bounds = array<i64: 1, 4>}, {pipeline_mode = #tpu.pipeline_mode<synchronous>, transform_indices = @transform_6, window_bounds = array<i64: 4, 8>}, {pipeline_mode = #tpu.pipeline_mode<synchronous>, transform_indices = @transform_7, window_bounds = array<i64: 1, 8>}, {pipeline_mode = #tpu.pipeline_mode<synchronous>, transform_indices = @transform_8, window_bounds = array<i64: 1, 8>}, {pipeline_mode = #tpu.pipeline_mode<synchronous>, transform_indices = @transform_9, window_bounds = array<i64: 1, 8>}, {transform_indices = @transform_10, window_bounds = array<i64: 1, 1, 8>}]} {
    %c0_i32 = arith.constant 0 : i32
    %0 = arith.cmpi eq, %arg1, %c0_i32 : i32
    %1 = arith.extui %0 : i1 to i32
    %c0_i32_0 = arith.constant 0 : i32
    %2 = arith.cmpi ne, %1, %c0_i32_0 : i32
    scf.if %2 {
      %cst_27 = arith.constant 0xFF800000 : f32
      %40 = vector.broadcast %cst_27 : f32 to vector<1x1xf32>
      %c0_28 = arith.constant 0 : index
      %c0_29 = arith.constant 0 : index
      %41 = vector.load %arg13[%c0_28, %c0_29] : memref<1x1xf32, #tpu.memory_space<vmem>>, vector<1x1xf32>
      tpu.vector_store %arg13[%c0_28, %c0_29], %40 {strides = array<i32>} : memref<1x1xf32, #tpu.memory_space<vmem>>, vector<1x1xf32>,
      %cst_30 = arith.constant 0.000000e+00 : f32
      %42 = vector.broadcast %cst_30 : f32 to vector<1x1xf32>
      %c0_31 = arith.constant 0 : index
      %c0_32 = arith.constant 0 : index
      %43 = vector.load %arg14[%c0_31, %c0_32] : memref<1x1xf32, #tpu.memory_space<vmem>>, vector<1x1xf32>
      tpu.vector_store %arg14[%c0_31, %c0_32], %42 {strides = array<i32>} : memref<1x1xf32, #tpu.memory_space<vmem>>, vector<1x1xf32>,
      %cst_33 = arith.constant 0.000000e+00 : f32
      %44 = vector.broadcast %cst_33 : f32 to vector<8x1xf32>
      %c0_34 = arith.constant 0 : index
      %c0_35 = arith.constant 0 : index
      %45 = vector.load %arg15[%c0_34, %c0_35] : memref<8x1xf32, #tpu.memory_space<vmem>>, vector<8x1xf32>
      tpu.vector_store %arg15[%c0_34, %c0_35], %44 {strides = array<i32>} : memref<8x1xf32, #tpu.memory_space<vmem>>, vector<8x1xf32>,
    } else {
    }
    %c0 = arith.constant 0 : index
    %c0_1 = arith.constant 0 : index
    %c0_2 = arith.constant 0 : index
    %3 = vector.load %arg2[%c0, %c0_1, %c0_2] : memref<1x8x256xf32, #tpu.memory_space<vmem>>, vector<1x8x256xf32>
    %4 = vector.shape_cast %3 : vector<1x8x256xf32> to vector<8x256xf32>
    %c0_3 = arith.constant 0 : index
    %c0_4 = arith.constant 0 : index
    %c0_5 = arith.constant 0 : index
    %5 = vector.load %arg3[%c0_3, %c0_4, %c0_5] : memref<1x8x256xf32, #tpu.memory_space<vmem>>, vector<1x8x256xf32>
    %6 = vector.shape_cast %5 : vector<1x8x256xf32> to vector<8x256xf32>
    %c0_6 = arith.constant 0 : index
    %c0_7 = arith.constant 0 : index
    %7 = vector.load %arg4[%c0_6, %c0_7] : memref<1x8xf32, #tpu.memory_space<vmem>>, vector<1x8xf32>
    %cst = arith.constant dense<0.000000e+00> : vector<1x256xf32>
    %8 = tpu.matmul %7, %6, %cst {dimension_numbers = #tpu.dot_dimension_numbers<[1], [0], [0], [1], [0, 0, 1, 1], [], []>} : vector<1x8xf32>, vector<8x256xf32>, vector<1x256xf32> -> vector<1x256xf32>
    %c0_8 = arith.constant 0 : index
    %c0_9 = arith.constant 0 : index
    %9 = vector.load %arg5[%c0_8, %c0_9] : memref<1x1xf32, #tpu.memory_space<vmem>>, vector<1x1xf32>
    %10 = vector.broadcast %9 : vector<1x1xf32> to vector<1x256xf32>
    %11 = arith.addf %8, %10 : vector<1x256xf32>
    %c0_10 = arith.constant 0 : index
    %c0_11 = arith.constant 0 : index
    %12 = vector.load %arg13[%c0_10, %c0_11] : memref<1x1xf32, #tpu.memory_space<vmem>>, vector<1x1xf32>
    %cst_12 = arith.constant dense<0xFF800000> : vector<1xf32>
    %13 = vector.multi_reduction <maximumf>, %11, %cst_12 [1] : vector<1x256xf32> to vector<1xf32>
    %14 = vector.shape_cast %13 : vector<1xf32> to vector<1x1xf32>
    %15 = arith.maximumf %12, %14 : vector<1x1xf32>
    %16 = arith.subf %12, %15 : vector<1x1xf32>
    %17 = math.exp %16 : vector<1x1xf32>
    %18 = vector.broadcast %15 : vector<1x1xf32> to vector<1x256xf32>
    %19 = arith.subf %11, %18 : vector<1x256xf32>
    %20 = math.exp %19 : vector<1x256xf32>
    %c0_13 = arith.constant 0 : index
    %c0_14 = arith.constant 0 : index
    %21 = vector.load %arg14[%c0_13, %c0_14] : memref<1x1xf32, #tpu.memory_space<vmem>>, vector<1x1xf32>
    %22 = arith.mulf %17, %21 : vector<1x1xf32>
    %cst_15 = arith.constant dense<0.000000e+00> : vector<1xf32>
    %23 = vector.multi_reduction <add>, %20, %cst_15 [1] : vector<1x256xf32> to vector<1xf32>
    %24 = vector.shape_cast %23 : vector<1xf32> to vector<1x1xf32>
    %25 = arith.addf %22, %24 : vector<1x1xf32>
    %c0_16 = arith.constant 0 : index
    %c0_17 = arith.constant 0 : index
    %26 = vector.load %arg14[%c0_16, %c0_17] : memref<1x1xf32, #tpu.memory_space<vmem>>, vector<1x1xf32>
    tpu.vector_store %arg14[%c0_16, %c0_17], %25 {strides = array<i32>} : memref<1x1xf32, #tpu.memory_space<vmem>>, vector<1x1xf32>,
    %c0_18 = arith.constant 0 : index
    %c0_19 = arith.constant 0 : index
    %27 = vector.load %arg15[%c0_18, %c0_19] : memref<8x1xf32, #tpu.memory_space<vmem>>, vector<8x1xf32>
    %28 = vector.broadcast %17 : vector<1x1xf32> to vector<8x1xf32>
    %29 = arith.mulf %28, %27 : vector<8x1xf32>
    %30 = vector.broadcast %20 : vector<1x256xf32> to vector<8x256xf32>
    %31 = arith.mulf %4, %30 : vector<8x256xf32>
    %cst_20 = arith.constant dense<0.000000e+00> : vector<8xf32>
    %32 = vector.multi_reduction <add>, %31, %cst_20 [1] : vector<8x256xf32> to vector<8xf32>
    %33 = vector.shape_cast %32 : vector<8xf32> to vector<8x1xf32>
    %34 = arith.addf %29, %33 : vector<8x1xf32>
    %c0_21 = arith.constant 0 : index
    %c0_22 = arith.constant 0 : index
    %35 = vector.load %arg15[%c0_21, %c0_22] : memref<8x1xf32, #tpu.memory_space<vmem>>, vector<8x1xf32>
    tpu.vector_store %arg15[%c0_21, %c0_22], %34 {strides = array<i32>} : memref<8x1xf32, #tpu.memory_space<vmem>>, vector<8x1xf32>,
    %c0_23 = arith.constant 0 : index
    %c0_24 = arith.constant 0 : index
    %36 = vector.load %arg13[%c0_23, %c0_24] : memref<1x1xf32, #tpu.memory_space<vmem>>, vector<1x1xf32>
    tpu.vector_store %arg13[%c0_23, %c0_24], %15 {strides = array<i32>} : memref<1x1xf32, #tpu.memory_space<vmem>>, vector<1x1xf32>,
    %c0_i32_25 = arith.constant 0 : i32
    %37 = arith.cmpi eq, %arg1, %c0_i32_25 : i32
    %38 = arith.extui %37 : i1 to i32
    %c0_i32_26 = arith.constant 0 : i32
    %39 = arith.cmpi ne, %38, %c0_i32_26 : i32
    scf.if %39 {
      %c0_27 = arith.constant 0 : index
      %c0_28 = arith.constant 0 : index
      %40 = vector.load %arg15[%c0_27, %c0_28] : memref<8x1xf32, #tpu.memory_space<vmem>>, vector<8x1xf32>
      %41 = tpu.transpose %40, [1, 0] : vector<8x1xf32> -> vector<1x8xf32>
      %c0_29 = arith.constant 0 : index
      %c0_30 = arith.constant 0 : index
      %42 = vector.load %arg14[%c0_29, %c0_30] : memref<1x1xf32, #tpu.memory_space<vmem>>, vector<1x1xf32>
      %43 = vector.broadcast %42 : vector<1x1xf32> to vector<1x8xf32>
      %44 = arith.divf %41, %43 : vector<1x8xf32>
      %c0_31 = arith.constant 0 : index
      %c0_32 = arith.constant 0 : index
      %45 = vector.load %arg6[%c0_31, %c0_32] : memref<8x4xf32, #tpu.memory_space<vmem>>, vector<8x4xf32>
      %cst_33 = arith.constant dense<0.000000e+00> : vector<1x4xf32>
      %46 = tpu.matmul %44, %45, %cst_33 {dimension_numbers = #tpu.dot_dimension_numbers<[1], [0], [0], [1], [0, 0, 1, 1], [], []>} : vector<1x8xf32>, vector<8x4xf32>, vector<1x4xf32> -> vector<1x4xf32>
      %c0_34 = arith.constant 0 : index
      %c0_35 = arith.constant 0 : index
      %47 = vector.load %arg7[%c0_34, %c0_35] : memref<1x4xf32, #tpu.memory_space<vmem>>, vector<1x4xf32>
      %48 = arith.addf %46, %47 : vector<1x4xf32>
      %c0_36 = arith.constant 0 : index
      %c0_37 = arith.constant 0 : index
      %49 = vector.load %arg8[%c0_36, %c0_37] : memref<4x8xf32, #tpu.memory_space<vmem>>, vector<4x8xf32>
      %cst_38 = arith.constant dense<0.000000e+00> : vector<1x8xf32>
      %50 = tpu.matmul %48, %49, %cst_38 {dimension_numbers = #tpu.dot_dimension_numbers<[1], [0], [0], [1], [0, 0, 1, 1], [], []>} : vector<1x4xf32>, vector<4x8xf32>, vector<1x8xf32> -> vector<1x8xf32>
      %c0_39 = arith.constant 0 : index
      %c0_40 = arith.constant 0 : index
      %51 = vector.load %arg9[%c0_39, %c0_40] : memref<1x8xf32, #tpu.memory_space<vmem>>, vector<1x8xf32>
      %52 = arith.addf %50, %51 : vector<1x8xf32>
      %cst_41 = arith.constant dense<0.000000e+00> : vector<1xf32>
      %53 = vector.multi_reduction <add>, %52, %cst_41 [1] : vector<1x8xf32> to vector<1xf32>
      %54 = vector.shape_cast %53 : vector<1xf32> to vector<1x1xf32>
      %cst_42 = arith.constant 8.000000e+00 : f32
      %55 = vector.broadcast %cst_42 : f32 to vector<1x1xf32>
      %56 = arith.divf %54, %55 : vector<1x1xf32>
      %57 = vector.broadcast %56 : vector<1x1xf32> to vector<1x8xf32>
      %58 = arith.subf %52, %57 : vector<1x8xf32>
      %59 = arith.mulf %58, %58 : vector<1x8xf32>
      %cst_43 = arith.constant dense<0.000000e+00> : vector<1xf32>
      %60 = vector.multi_reduction <add>, %59, %cst_43 [1] : vector<1x8xf32> to vector<1xf32>
      %61 = vector.shape_cast %60 : vector<1xf32> to vector<1x1xf32>
      %cst_44 = arith.constant 8.000000e+00 : f32
      %62 = vector.broadcast %cst_44 : f32 to vector<1x1xf32>
      %63 = arith.divf %61, %62 : vector<1x1xf32>
      %64 = vector.broadcast %56 : vector<1x1xf32> to vector<1x8xf32>
      %65 = arith.subf %52, %64 : vector<1x8xf32>
      %cst_45 = arith.constant 9.99999974E-6 : f32
      %66 = vector.broadcast %cst_45 : f32 to vector<1x1xf32>
      %67 = arith.addf %63, %66 : vector<1x1xf32>
      %68 = math.rsqrt %67 : vector<1x1xf32>
      %69 = vector.broadcast %68 : vector<1x1xf32> to vector<1x8xf32>
      %70 = arith.mulf %65, %69 : vector<1x8xf32>
      %c0_46 = arith.constant 0 : index
      %c0_47 = arith.constant 0 : index
      %71 = vector.load %arg10[%c0_46, %c0_47] : memref<1x8xf32, #tpu.memory_space<vmem>>, vector<1x8xf32>
      %72 = arith.mulf %70, %71 : vector<1x8xf32>
      %c0_48 = arith.constant 0 : index
      %c0_49 = arith.constant 0 : index
      %73 = vector.load %arg11[%c0_48, %c0_49] : memref<1x8xf32, #tpu.memory_space<vmem>>, vector<1x8xf32>
      %74 = arith.addf %72, %73 : vector<1x8xf32>
      %75 = arith.negf %74 : vector<1x8xf32>
      %76 = math.exp %75 : vector<1x8xf32>
      %cst_50 = arith.constant 1.000000e+00 : f32
      %77 = vector.broadcast %cst_50 : f32 to vector<1x8xf32>
      %78 = arith.addf %77, %76 : vector<1x8xf32>
      %79 = arith.divf %77, %78 : vector<1x8xf32>
      %c0_51 = arith.constant 0 : index
      %c0_52 = arith.constant 0 : index
      %c0_53 = arith.constant 0 : index
      %80 = vector.load %arg12[%c0_51, %c0_52, %c0_53] : memref<1x1x8xf32, #tpu.memory_space<vmem>>, vector<1x1x8xf32>
      %81 = vector.shape_cast %80 : vector<1x1x8xf32> to vector<1x8xf32>
      %82 = vector.shape_cast %79 : vector<1x8xf32> to vector<1x1x8xf32>
      tpu.vector_store %arg12[%c0_51, %c0_52, %c0_53], %82 {strides = array<i32>} : memref<1x1x8xf32, #tpu.memory_space<vmem>>, vector<1x1x8xf32>,
    } else {
    }
    return
  }
  func.func @transform_0(%arg0: i32, %arg1: i32) -> (i32, i32, i32) {
    %c0_i32 = arith.constant 0 : i32
    %c0_i32_0 = arith.constant 0 : i32
    return %arg0, %c0_i32, %arg1 : i32, i32, i32
  }
  func.func @transform_1(%arg0: i32, %arg1: i32) -> (i32, i32, i32) {
    %c0_i32 = arith.constant 0 : i32
    %c0_i32_0 = arith.constant 0 : i32
    return %arg0, %c0_i32, %arg1 : i32, i32, i32
  }
  func.func @transform_2(%arg0: i32, %arg1: i32) -> (i32, i32) {
    %c0_i32 = arith.constant 0 : i32
    %c0_i32_0 = arith.constant 0 : i32
    %c0_i32_1 = arith.constant 0 : i32
    return %c0_i32, %c0_i32_0 : i32, i32
  }
  func.func @transform_3(%arg0: i32, %arg1: i32) -> (i32, i32) {
    %c0_i32 = arith.constant 0 : i32
    %c0_i32_0 = arith.constant 0 : i32
    %c0_i32_1 = arith.constant 0 : i32
    return %c0_i32, %c0_i32_0 : i32, i32
  }
  func.func @transform_4(%arg0: i32, %arg1: i32) -> (i32, i32) {
    %c0_i32 = arith.constant 0 : i32
    %c0_i32_0 = arith.constant 0 : i32
    %c0_i32_1 = arith.constant 0 : i32
    return %c0_i32, %c0_i32_0 : i32, i32
  }
  func.func @transform_5(%arg0: i32, %arg1: i32) -> (i32, i32) {
    %c0_i32 = arith.constant 0 : i32
    %c0_i32_0 = arith.constant 0 : i32
    %c0_i32_1 = arith.constant 0 : i32
    return %c0_i32, %c0_i32_0 : i32, i32
  }
  func.func @transform_6(%arg0: i32, %arg1: i32) -> (i32, i32) {
    %c0_i32 = arith.constant 0 : i32
    %c0_i32_0 = arith.constant 0 : i32
    %c0_i32_1 = arith.constant 0 : i32
    return %c0_i32, %c0_i32_0 : i32, i32
  }
  func.func @transform_7(%arg0: i32, %arg1: i32) -> (i32, i32) {
    %c0_i32 = arith.constant 0 : i32
    %c0_i32_0 = arith.constant 0 : i32
    %c0_i32_1 = arith.constant 0 : i32
    return %c0_i32, %c0_i32_0 : i32, i32
  }
  func.func @transform_8(%arg0: i32, %arg1: i32) -> (i32, i32) {
    %c0_i32 = arith.constant 0 : i32
    %c0_i32_0 = arith.constant 0 : i32
    %c0_i32_1 = arith.constant 0 : i32
    return %c0_i32, %c0_i32_0 : i32, i32
  }
  func.func @transform_9(%arg0: i32, %arg1: i32) -> (i32, i32) {
    %c0_i32 = arith.constant 0 : i32
    %c0_i32_0 = arith.constant 0 : i32
    %c0_i32_1 = arith.constant 0 : i32
    return %c0_i32, %c0_i32_0 : i32, i32
  }
  func.func @transform_10(%arg0: i32, %arg1: i32) -> (i32, i32, i32) {
    %c0_i32 = arith.constant 0 : i32
    %c0_i32_0 = arith.constant 0 : i32
    %c0_i32_1 = arith.constant 0 : i32
    return %arg0, %c0_i32, %c0_i32_0 : i32, i32, i32
  }
}

</mosaic_0001>

<bundles_post_ra>
// kernel: tpu_custom_call.1
= control target key start
LH: loop header
LB: loop body
LE: loop exit
PB: predicated region body
PF: predicated region fallthrough
CT: control target
= control target key end

     0   :  { %s1496_s0 = inlined_call_operand.hbm [shape: f32[2,8,256], index: 0, kind: input, shape index: {}]   ;;  %s1497_s1 = inlined_call_operand.hbm [shape: f32[2,8,256], index: 1, kind: input, shape index: {}]   ;;  %s1498_s2 = inlined_call_operand.vmem [shape: f32[1,8], index: 2, kind: input, shape index: {}]   ;;  %s1499_s3 = inlined_call_operand.<no memory space> [shape: f32[1,1], index: 3, kind: input, shape index: {}]   ;;  %s1500_s4 = inlined_call_operand.vmem [shape: f32[8,4], index: 4, kind: input, shape index: {}]   ;;  %s1501_s5 = inlined_call_operand.vmem [shape: f32[1,4], index: 5, kind: input, shape index: {}]   ;;  %s1502_s6 = inlined_call_operand.vmem [shape: f32[4,8], index: 6, kind: input, shape index: {}]   ;;  %s1503_s7 = inlined_call_operand.vmem [shape: f32[1,8], index: 7, kind: input, shape index: {}]   ;;  %s1504_s8 = inlined_call_operand.vmem [shape: f32[1,8], index: 8, kind: input, shape index: {}]   ;;  %s1505_s9 = inlined_call_operand.vmem [shape: f32[1,8], index: 9, kind: input, shape index: {}]   ;;  %s1506_s10 = inlined_call_operand.hbm [shape: f32[2,1,8], index: 10, kind: output, shape index: {}]  }
   0x1   :  { %1510 = sst [smem:[#allocation19_spill]] %s1496_s0  ;;  %v15_v0 = vstv %s1499_s3 }
   0x2   :  { %16 = vst [vmem:[#allocation5] sm:$0x1] %v15_v0 }
   0x3   :  { %17 = vsyncpa [#allocation7], 0 }
   0x4   :  { %19 = vsyncpa [#allocation7 + $0x1], 0 }
   0x5   :  { %20 = vsyncpa [#allocation10], 0 }
   0x6   :  { %22 = vsyncpa [#allocation10 + $0x1], 0 }
   0x7   :  { %23 = vsyncpa [#allocation8], 0 }
   0x8   :  { %25 = vsyncpa [#allocation8 + $0x1], 0  ;;  %s1273_s15 = smov 0   ;;  %s1275_s16 = smov 0  }
   0x9   :  { %s1277_s17 = smov 0   ;;  %s1279_s18 = smov 0  }
   0xa   :  { %s1281_s19 = smov 0   ;;  %s1283_s20 = smov 0  }
   0xb LB: > { %1511 = sst [smem:[#allocation15_spill]] %s1194_s17  ;;  %s942_s3 = sadd.s32 4294967295, %s1206_s20   ;;  %s1206_s20 = sphi %s1283_s20, %s31_s20   ;;  %s1202_s19 = sphi %s1281_s19, %s1526_s19   ;;  %s1198_s18 = sphi %s1279_s18, %s1525_s18   ;;  %s1194_s17 = sphi %s1277_s17, %s1524_s17   ;;  %s1190_s16 = sphi %s1275_s16, %s1528_s16   ;;  %s1186_s15 = sphi %s1273_s15, %s1527_s15  }
   0xc   : > { %1512 = sst [smem:[#allocation16_spill]] %s1202_s19  ;;  %s943_s21 = sadd.s32 4294967294, %s1206_s20  }
   0xd   : > { %s43_s22 = sadd.s32 1, %s1202_s19  ;;  %s52_s23 = sadd.s32 1, %s1194_s17 }
   0xe   : > { %p45_p0 = scmp.ge.s32.totalorder %s43_s22, 2  ;;  %p59_p1 = scmp.ne.s32.totalorder %s1194_s17, %s1190_s16 }
   0xf   : > { %p60_p2 = scmp.eq.s32.totalorder %s1206_s20, 0  ;;  %p65_p3 = scmp.ne.s32.totalorder %s1190_s16, %s1186_s15 }
  0x10   : > { %s1530_s22 = smov (%p45_p0, %s43_s22), 0  ;;  %p66_p5 = scmp.eq.s32.totalorder %s942_s3, 0 }
  0x11   : > { %1513 = sst [smem:[#allocation17_spill]] %s1530_s22  ;;  %p1314_p4 = por %p60_p2, %p59_p1 }
  0x12   : > { %s47_s25 = ssub.s32 %s1202_s19, %s1530_s22  ;;  %p285_p6 = scmp.eq.s32.totalorder %s942_s3, 1 }
  0x13   : > { %p50_p7 = scmp.eq.s32.totalorder %s47_s25, 0  ;;  %p1320_p8 = por %p66_p5, %p65_p3 }
  0x14   : > { %p1324_p9 = por %p285_p6, %p59_p1  ;;  %p291_p10 = scmp.eq.s32.totalorder %s943_s21, 1 }
  0x15   : > { %s1329_s28 = scalar_select %p50_p7, %s1194_s17, %s52_s23  }
  0x16   : > { %p1331_p11 = por %p291_p10, %p65_p3  ;;  %p996_p13 = scmp.lt.s32.totalorder %s1206_s20, 2 }
  0x17   : > { %1517 = sst [smem:[#allocation18_spill]] %s1329_s28  ;;  %s1338_s30 = sand.u32 1, %s1194_s17  }
  0x18   : > { %s946_s11 = sshll.u32 %s1338_s30, 4  ;;  %s963_s12 = sshll.u32 %s1202_s19, 8 }
  0x19   : > { %s1519_s0 = sld [smem:[#allocation19_spill]]  ;;  %s339_s25 = scalar_lea.vmem [#allocation6], %s946_s11 }
  0x1a   : > { %s349_s21 = sshll.u32 %s339_s25, 4  ;;  %p1347_p0 = pnand %p996_p13, %p1314_p4  ;;  %s350_s21 = int_to_ptr.vmem [resolvable:$true] %s349_s21 }
  0x1b   : > { %p952_p1 = scmp.ge.s32.totalorder %s1206_s20, 1  ;;  %p375_p2 = scmp.lt.s32.totalorder %s1206_s20, 3 }
  0x1c   : > { %s336_s22 = scalar_lea.sflag [#allocation7], %s1338_s30  ;;  %p1068_p3 = pneg %p1347_p0 }
  0x1d   : > { %s1079_s19 = scalar_lea.vmem %s350_s21, 256  ;;  %s1208_s13 = smov [#allocation6]  }
  0x1e   : > { %p1080_p5 = scmp.ne.s32.totalorder %s350_s21, %s1079_s19  ;;  %s1084_s14 = sshll.u32 %s1208_s13, 4  ;;  %s1085_s14 = int_to_ptr.vmem [resolvable:$false] %s1084_s14 }
  0x1f   : > { %s347_s3 = scalar_lea.hbm %s1519_s0, %s963_s12  ;;  %s1086_s24 = scalar_lea.vmem %s1085_s14, 512 }
  0x20   : > { %p1082_p6 = pnand %p1080_p5, %p1068_p3  ;;  %p1087_p4 = scmp.lt.s32.totalorder %s350_s21, %s1085_s14 }
  0x21   : > { %p1088_p10 = scmp.lt.s32.totalorder %s1086_s24, %s1079_s19 }
  0x22   : > { %p1083_p7 = pneg %p1082_p6 }
  0x23   : > { %p1089_p13 = por %p1088_p10, %p1087_p4 }
  0x25   : > { %p1090_p12 = pnand %p1089_p13, %p1083_p7 }
  0x27   : > { %1093 = shalt.err (!%p1090_p12)
}
  0x28   : > { %988 = dma.hbm_to_vmem [thread:$0]  (!%p1347_p0), %s347_s3, 256, %s350_s21, %s336_s22  }
  0x29   : > { %p1365_p5 = pnand %p952_p1, %p375_p2  ;;  %s368_s19 = scalar_lea.hbm %s1497_s1, %s963_s12 }
  0x2a   : > { %s360_s14 = scalar_lea.vmem [#allocation9], %s946_s11  ;;  %s357_s28 = scalar_lea.sflag [#allocation10], %s1338_s30 }
  0x2b   : > { %s370_s24 = sshll.u32 %s360_s14, 4  ;;  %s1209_s22 = smov [#allocation9]   ;;  %s371_s24 = int_to_ptr.vmem [resolvable:$true] %s370_s24 }
  0x2c   : > { %s1107_s17 = scalar_lea.vmem %s371_s24, 256  ;;  %s1112_s3 = sshll.u32 %s1209_s22, 4  ;;  %s1113_s3 = int_to_ptr.vmem [resolvable:$false] %s1112_s3 }
  0x2d   : > { %p1108_p12 = scmp.ne.s32.totalorder %s371_s24, %s1107_s17  ;;  %s1114_s21 = scalar_lea.vmem %s1113_s3, 512 }
  0x2e   : > { %p1115_p1 = scmp.lt.s32.totalorder %s371_s24, %s1113_s3  ;;  %p1116_p2 = scmp.lt.s32.totalorder %s1114_s21, %s1107_s17 }
  0x2f   : > { %p1110_p6 = pnand %p1108_p12, %p1068_p3 }
  0x30   : > { %p1117_p4 = por %p1116_p2, %p1115_p1 }
  0x31   : > { %p1111_p7 = pneg %p1110_p6 }
  0x33   : > { %p1118_p10 = pnand %p1117_p4, %p1111_p7 }
  0x35   : > { %1121 = shalt.err (!%p1118_p10)
}
  0x36   : > { %991 = dma.hbm_to_vmem [thread:$0]  (!%p1347_p0), %s368_s19, 256, %s371_s24, %s357_s28  }
  0x37   : > { %379 = sbr.rel (%p1365_p5) target bundleno = 1589 (0x635), region = 60  ;;  %s1381_s0 = sand.u32 (!%p1365_p5), 1, %s1190_s16  }
  0x38   : > { %s953_s30 = sshll.u32 (!%p1365_p5), %s1381_s0, 4  ;;  %s382_s11 = scalar_lea.sflag (!%p1365_p5), [#allocation7], %s1381_s0 }
  0x39   : > { %s1385_s12 = scalar_lea.vmem (!%p1365_p5), [#allocation6], %s953_s30 }
  0x3c   : > { %1173 = dma.done.wait (%p1320_p8), %s382_s11, 256  }
  0x3d   : > { %1175 = vsyncadd (%p1320_p8), %s382_s11, 4294967040  ;;  %s391_s17 = scalar_lea.sflag [#allocation10], %s1381_s0  ;;  %s394_s28 = scalar_lea.vmem [#allocation9], %s953_s30 }
  0x3e   : > { %1177 = dma.done.wait (%p1320_p8), %s391_s17, 256  }
  0x3f   : > { %1179 = vsyncadd (%p1320_p8), %s391_s17, 4294967040  ;;  %v1210_v1 = vmov 0.0   ;;  %v1211_v2 = vmov 0   ;;  %v449_v3 = vld [vmem:[%s394_s28 + $0x8] sm:$0xff]  ;;  %v448_v4 = vld [vmem:[%s394_s28] sm:$0xff]  ;;  %vm461_vm0 = vcmask 64512   ;;  %v457_v8 = vlaneseq }
  0x40   : > { %529 = vmatprep.mubr.f32.mxu0 %v1210_v1  ;;  %1050 = vset.pattern.permute.xlu0 %v1211_v2  ;;  %v450_v5 = vld [vmem:[%s1498_s2] sm:$0x1]  ;;  %v451_v6 = vld [vmem:[#allocation5] sm:$0x1]  ;;  %vm441_vm1 = vcmask 0   ;;  %v1212_v7 = vmov -inf  }
  0x41   : > { %1051 = vset.pattern.permute.xlu1 %v1211_v2  ;;  %969 = vmatprep.subr.mxu1 %v1210_v1  ;;  %442 = vst.msk [vmem:[#allocation2] sm:$0x1] %vm441_vm1, %v1212_v7  ;;  %443 = vst.msk [vmem:[#allocation3] sm:$0x1] %vm441_vm1, %v1210_v1  ;;  %v458_v9 = vshrl.u32 %v457_v8, 7  ;;  %vm537_vm2 = vcmask 1040384  }
  0x42   : > { %495 = vmatprep.subr.mxu0 %v449_v3  ;;  %454 = vperm.xlu0 %1050, %v451_v6   ;;  %vm444_vm3 = vcmask 7168   ;;  %v446_v31 = vld [vmem:[%s1385_s12] sm:$0xff]  ;;  %v447_v34 = vld [vmem:[%s1385_s12 + $0x8] sm:$0xff]  ;;  %vm1213_vm4 = vmmov 0   ;;  %vm726_vm5 = vcmask 1043456   ;;  %vm722_vm6 = vcmask 31744  }
  0x43   : > { %496 = vmatpush1.msra.mxu0 %v448_v4  ;;  %v1406_v10 = vsub.s32 0, %v458_v9  ;;  %445 = vst.msk [vmem:[#allocation4] sm:$0xff] %vm444_vm3, %v1210_v1  ;;  %v645_v55 = vld [vmem:[%s1500_s4] sm:$0xff]  ;;  %971 = vmatprep.mubr.msk.f32.mxu1 %vm1213_vm4, %v1210_v1  ;;  %vm800_vm7 = vcmask 57344   ;;  %s960_s28 = sshll.u32 %s1198_s18, 4  ;;  %s434_s23 = scalar_lea.vmem [#allocation11], %s1381_s0 }
  0x44   : > { %955 = vmatmul.mubr.msk.f32.vlgmr.msra.gmra.mxu0 %vm461_vm0, %v450_v5  ;;  %974 = vmatprep.subr.mxu0 %v1210_v1  ;;  %v720_v56 = vld [vmem:[%s1502_s6] sm:$0xf]  ;;  %s839_s25 = sshll.u32 %s434_s23, 4  ;;  %s1453_s19 = scalar_lea.hbm %s1506_s10, %s960_s28  ;;  %s840_s25 = int_to_ptr.vmem [resolvable:$true] %s839_s25 }
  0x45   : > { %970 = vmatpush3.msra.mxu1 %v645_v55  ;;  %976 = vmatprep.mubr.msk.f32.mxu0 %vm1213_vm4, %v1210_v1  ;;  %v646_v62 = vld [vmem:[%s1501_s5] sm:$0x1]  ;;  %s827_s14 = scalar_lea.sflag [#allocation8], %s1381_s0  ;;  %s1122_s24 = scalar_lea.vmem %s840_s25, 16 }
  0x46   : > { %975 = vmatpush3.msk.msra.mxu0 %vm726_vm5, %v720_v56  ;;  %v721_v1 = vld [vmem:[%s1503_s7] sm:$0x1]  ;;  %p1123_p8 = scmp.ne.s32.totalorder %s840_s25, %s1122_s24  ;;  %s1214_s22 = smov [#allocation11]  }
  0x47   : > { %s1126_s3 = sshll.u32 %s1214_s22, 4  ;;  %s1127_s3 = int_to_ptr.vmem [resolvable:$false] %s1126_s3 }
  0x48   : > { %v536_v20 = vld [vmem:[#allocation2] sm:$0x1]  ;;  %v562_v44 = vld [vmem:[#allocation3] sm:$0x1]  ;;  %p1124_p0 = pnand %p1123_p8, %p1324_p9  ;;  %s1128_s18 = scalar_lea.vmem %s1127_s3, 32 }
  0x49   : > { %p1129_p13 = scmp.lt.s32.totalorder %s840_s25, %s1127_s3  ;;  %p1130_p5 = scmp.lt.s32.totalorder %s1128_s18, %s1122_s24 }
  0x4a   : > { %v572_v47 = vld [vmem:[#allocation4] sm:$0xff]  ;;  %p1125_p3 = pneg %p1124_p0 }
  0x4b   : > { %p1131_p12 = por %p1130_p5, %p1129_p13 }
  0x4d   : > { %p1132_p6 = pnand %p1131_p12, %p1125_p3 }
  0xbd   : > { %v455_v11 = vpop.permute.xlu0 %454 }
  0xbe   : > { %v460_v12 = vrot.slane %v455_v11, %v1406_v10 }
 0x104   : > { %v531_v13 = vpop.f32.mrf.mxu0 }
 0x105   : > { %v532_v14 = vadd.f32 %v531_v13, %v460_v12 }
 0x106   : > { %v533_v15 = vpop.f32.mrf.mxu0 }
 0x107   : > { %v534_v16 = vadd.f32 %v533_v15, %v460_v12  ;;  %v538_v17 = vsel %vm537_vm2, %v532_v14, -inf }
 0x109   : > { %v539_v18 = vsel %vm537_vm2, %v534_v16, -inf }
 0x10a   : > { %v540_v19 = vmax.f32 %v538_v17, %v539_v18  ;;  %v817_v18 = vld [vmem:[%s1505_s9] sm:$0x1] }
 0x10c   : > { %541 = vmax.xlane.f32.xlu0 %v540_v19 }
 0x195   : > { %v542_v21 = vpop.xlane.xlu0 %541 }
 0x196   : > { %v543_v22 = vmax.f32 %v536_v20, %v542_v21 }
 0x198   : > { %v544_v23 = vsub.f32 %v536_v20, %v543_v22  ;;  %596 = vst.msk [vmem:[#allocation2] sm:$0x1] %vm441_vm1, %v543_v22  ;;  %549 = vperm.xlu1 %1051, %v543_v22  }
 0x19a   : > { %v545_v42 = vmul.f32 1.442695, %v544_v23 }
 0x213   : > { %v550_v24 = vpop.permute.xlu1 %549 }
 0x214   : > { %v555_v25 = vrot.slane %v550_v24, %v1406_v10 }
 0x216   : > { %v556_v26 = vsub.f32 %v532_v14, %v555_v25  ;;  %v557_v27 = vsub.f32 %v534_v16, %v555_v25  ;;  %v815_v16 = vld [vmem:[%s1504_s8] sm:$0x1] }
 0x218   : > { %v558_v28 = vmul.f32 1.442695, %v556_v26  ;;  %v560_v29 = vmul.f32 1.442695, %v557_v27 }
 0x21a   : > { %1052 = vpow2.f32 %v558_v28 }
 0x21b   : > { %1054 = vpow2.f32 %v560_v29 }
 0x21c   : > { %1056 = vpow2.f32 %v545_v42 }
 0x227   : > { %v1053_v30 = vpop.eup %1052 }
 0x228   : > { %v1055_v32 = vpop.eup %1054  ;;  %v564_v33 = vsel %vm537_vm2, %v1053_v30, 0.0  ;;  %v583_v35 = vrot.slane %v1053_v30, %v1406_v10 }
 0x229   : > { %v565_v36 = vsel %vm537_vm2, %v1055_v32, 0.0  ;;  %v587_v37 = vrot.slane %v1055_v32, %v1406_v10  ;;  %v1057_v43 = vpop.eup %1056 }
 0x22a   : > { %v566_v38 = vadd.f32 %v565_v36, %v564_v33  ;;  %v588_v39 = vmul.f32 %v583_v35, %v446_v31  ;;  %v577_v45 = vrot.slane %v1057_v43, %v1406_v10  ;;  %v563_v46 = vmul.f32 %v1057_v43, %v562_v44 }
 0x22b   : > { %v589_v40 = vmul.f32 %v587_v37, %v447_v34 }
 0x22c   : > { %567 = vadd.xlane.f32.xlu1 %v566_v38  ;;  %v579_v50 = vmul.f32 %v577_v45, %v572_v47 }
 0x22d   : > { %v590_v41 = vadd.f32 %v589_v40, %v588_v39 }
 0x22f   : > { %591 = vadd.xlane.f32.xlu0 %v590_v41 }
 0x2b5   : > { %v568_v48 = vpop.xlane.xlu1 %567 }
 0x2b6   : > { %v569_v49 = vadd.f32 %v568_v48, %v563_v46 }
 0x2b8   : > { %571 = vst.msk [vmem:[#allocation3] sm:$0x1] %vm441_vm1, %v569_v49  ;;  %v592_v51 = vpop.xlane.xlu0 %591 }
 0x2b9   : > { %v593_v52 = vadd.f32 %v592_v51, %v579_v50 }
 0x2bb   : > { %595 = vst.msk [vmem:[#allocation4] sm:$0xff] %vm444_vm3, %v593_v52 }
 0x2bf   : > { %v633_v53 = vld [vmem:[#allocation3] sm:$0x1] }
 0x2c0   : > { %636 = vperm.xlu0 %1050, %v633_v53  }
 0x2c2   : > { %v600_v54 = vld [vmem:[#allocation4] sm:$0xff] }
 0x2c3   : > { %601 = vxpose.xlu1.b32.start.end [1/1] (short) (narrow) %v600_v54, 8 }
 0x33b   : > { %v637_v57 = vpop.permute.xlu0 %636 }
 0x33c   : > { %v642_v58 = vrot.slane %v637_v57, %v1406_v10 }
 0x33e   : > { %1058 = vrcp.f32 %v642_v58 }
 0x33f   : > { %v617_v59 = vpop.trf.xlu1 }
 0x34b   : > { %v1059_v60 = vpop.eup %1058 }
 0x34c   : > { %v644_v61 = vmul.f32 %v1059_v60, %v617_v59 }
 0x34e   : > { %972 = vmatmul.mubr.msk.f32.vlgmr.msra.gmra.mxu1 %vm461_vm0, %v644_v61 }
 0x40e   : > { %v716_v63 = vpop.f32.mrf.mxu1 }
 0x40f   : > { %v717_v0 = vadd.f32 %v716_v63, %v646_v62 }
 0x410   : > { %v973_v2 = vpop.f32.mrf.mxu1 }
 0x411   : > { %977 = vmatmul.mubr.msk.f32.vlgmr.msra.gmra.mxu0 %vm722_vm6, %v717_v0 }
 0x4d1   : > { %v796_v3 = vpop.f32.mrf.mxu0 }
 0x4d2   : > { %v797_v4 = vadd.f32 %v796_v3, %v721_v1 }
 0x4d3   : > { %v978_v5 = vpop.f32.mrf.mxu0 }
 0x4d4   : > { %v801_v6 = vsel %vm800_vm7, %v797_v4, 0.0 }
 0x4d5   : > { %802 = vadd.xlane.f32.xlu0 %v801_v6 }
 0x55e   : > { %v803_v7 = vpop.xlane.xlu0 %802 }
 0x55f   : > { %v805_v8 = vmul.f32 0.125, %v803_v7 }
 0x561   : > { %v806_v9 = vsub.f32 %v797_v4, %v805_v8 }
 0x563   : > { %v807_v10 = vmul.f32 %v806_v9, %v806_v9 }
 0x565   : > { %v808_v11 = vsel %vm800_vm7, %v807_v10, 0.0 }
 0x566   : > { %809 = vadd.xlane.f32.xlu1 %v808_v11 }
 0x5ef   : > { %v810_v12 = vpop.xlane.xlu1 %809 }
 0x5f0   : > { %v811_v13 = vmul.f32 0.125, %v810_v12 }
 0x5f2   : > { %v812_v14 = vadd.f32 1e-05, %v811_v13 }
 0x5f4   : > { %1060 = vrsqrt.f32 %v812_v14 }
 0x601   : > { %v1061_v15 = vpop.eup %1060 }
 0x602   : > { %v814_v17 = vmul.f32 %v1061_v15, %v806_v9 }
 0x604   : > { %v816_v19 = vmul.f32 %v815_v16, %v814_v17 }
 0x606   : > { %v818_v20 = vadd.f32 %v817_v18, %v816_v19 }
 0x608   : > { %v959_v21 = vmul.f32 -1.442695, %v818_v20 }
 0x60a   : > { %1062 = vpow2.f32 %v959_v21 }
 0x617   : > { %v1063_v22 = vpop.eup %1062 }
 0x618   : > { %v822_v23 = vadd.f32 1.0, %v1063_v22 }
 0x61a   : > { %1064 = vrcp.f32 %v822_v23 }
 0x627   : > { %v1065_v24 = vpop.eup %1064 }
 0x628   : > { %825 = vst.msk [vmem:[%s434_s23] sm:$0x1] %vm800_vm7, %v1065_v24 }
 0x629   : > { %1135 = shalt.err (!%p1132_p6)
}
 0x62a   : > { %s1136_s21 = scalar_lea.hbm %s1453_s19, 16  ;;  %s1140_s11 = scalar_lea.hbm %s1506_s10, 32 }
 0x62b   : > { %p1137_p7 = scmp.ne.s32.totalorder %s1453_s19, %s1136_s21  ;;  %p1141_p4 = scmp.lt.s32.totalorder %s1453_s19, %s1506_s10 }
 0x62c   : > { %p1142_p10 = scmp.lt.s32.totalorder %s1140_s11, %s1136_s21 }
 0x62d   : > { %p1138_p1 = pnand %p1137_p7, %p1324_p9 }
 0x62e   : > { %p1143_p8 = por %p1142_p10, %p1141_p4 }
 0x62f   : > { %p1139_p2 = pneg %p1138_p1 }
 0x631   : > { %p1144_p0 = pnand %p1143_p8, %p1139_p2 }
 0x633   : > { %1147 = shalt.err (!%p1144_p0)
}
 0x634   : > { %983 = dma.vmem_to_hbm [thread:$0]  (%p1324_p9), %s840_s25, 16, %s1453_s19, %s827_s14  }
 0x635 PF: > { %s851_s28 = sand.u32 1, %s1186_s15   ;;  %p1522_p3 = scmp.ge.s32.totalorder %s1206_s20, 2 }
 0x636   : > { %s852_s23 = scalar_lea.sflag [#allocation8], %s851_s28 }
 0x637   : > { %p993_p13 = pnand %p1522_p3, %p1331_p11 }
 0x639   : > { %p994_p5 = pneg %p993_p13 }
 0x63b   : > { %1181 = dma.done.wait (%p994_p5), %s852_s23, 16  }
 0x63c   : > { %1183 = vsyncadd (%p994_p5), %s852_s23, 4294967280  ;;  %s31_s20 = sadd.s32 1, %s1206_s20   ;;  %s1523_s26 = sld [smem:[#allocation15_spill]] }
 0x63d   : > { %p28_p12 = scmp.ge.s32.totalorder %s31_s20, 4   ;;  %s1524_s17 = sld [smem:[#allocation18_spill]] }
 0x63e   : > { %s1525_s18 = sld [smem:[#allocation16_spill]]  ;;  %s1527_s15 = smov %s1190_s16 }
 0x63f   : > { %s1526_s19 = sld [smem:[#allocation17_spill]]  ;;  %30 = sbr.rel (!%p28_p12) target bundleno = 11 (0xb), region = 126 }
 0x642   : > { %s1528_s16 = smov %s1523_s26 }
 0x644   :  { %856 = vsyncpa [#allocation7], 1 }
 0x645   :  { %858 = vsyncpa [#allocation7 + $0x1], 1 }
 0x646   :  { %859 = vsyncpa [#allocation10], 1 }
 0x647   :  { %861 = vsyncpa [#allocation10 + $0x1], 1 }
 0x648   :  { %862 = vsyncpa [#allocation8], 1 }
 0x649   :  { %864 = vsyncpa [#allocation8 + $0x1], 1 }

</bundles_post_ra>
